<compile_context>
chip_gen: v7x
topology: tpu7x:2x2x1
jax: 0.10.0
libtpu: 0.0.40
codegen_flags: <defaults>
</compile_context>

<pallas_src>
import functools

import jax
import jax.numpy as jnp
from jax.experimental import pallas as pl
from jax.experimental.pallas import tpu as pltpu

_EPS = 1e-12  # torch.nn.functional.normalize default eps


def _l2_normalize_kernel(x_ref, o_ref):
    # x_ref / o_ref: (block_b, D) tile in VMEM
    x = x_ref[...].astype(jnp.float32)
    sq_sum = jnp.sum(x * x, axis=1, keepdims=True)            # (block_b, 1)
    # 1 / max(||x||, eps)  ==  rsqrt(max(sum(x^2), eps^2));  EUP op + VALU mul.
    inv_norm = jax.lax.rsqrt(jnp.maximum(sq_sum, _EPS * _EPS))
    o_ref[...] = (x * inv_norm).astype(o_ref.dtype)


def _round_up(n: int, m: int) -> int:
    return ((n + m - 1) // m) * m


def _choose_block_b(B: int, D: int, dtype, target_tile_bytes: int) -> int:
    """Pick a batch tile so each (block_b, D) tile is ~target_tile_bytes."""
    itemsize = jnp.dtype(dtype).itemsize
    # sublane packing: 8 rows for f32, 16 for bf16, 32 for 8-bit dtypes
    sublane = 8 * max(1, 4 // itemsize)
    rows = (target_tile_bytes // (itemsize * max(D, 1))) // sublane * sublane
    rows = max(rows, sublane)
    # no point tiling past the (sublane-padded) batch
    return min(rows, _round_up(B, sublane))


@functools.partial(jax.jit, static_argnames=("target_tile_bytes",))
def normalize_sentence_embedding(
    x: jax.Array, *, target_tile_bytes: int = 4 << 20
) -> jax.Array:
    """L2-normalize each row of x (shape (B, D)) along dim=1."""
    B, D = x.shape
    block_b = _choose_block_b(B, D, x.dtype, target_tile_bytes)

    # Pad batch to a multiple of block_b. Padded rows are all-zero -> their
    # norm clamps to eps -> output zeros; they are sliced off below.
    B_pad = _round_up(B, block_b)
    if B_pad != B:
        x_in = jnp.pad(x, ((0, B_pad - B), (0, 0)))
    else:
        x_in = x

    tile_bytes = block_b * D * jnp.dtype(x.dtype).itemsize
    # double-buffered input + output tiles (+ f32 upcast / slack headroom)
    vmem_limit = max(4 * tile_bytes + (8 << 20), 32 << 20)
    vmem_limit = min(vmem_limit, 48 << 20)  # stay safe on v7x (64 MiB physical)

    out = pl.pallas_call(
        _l2_normalize_kernel,
        out_shape=jax.ShapeDtypeStruct((B_pad, D), x.dtype),
        grid_spec=pltpu.PrefetchScalarGridSpec(
            num_scalar_prefetch=0,
            grid=(B_pad // block_b,),
            # keep full D per block (lane-dense output, single-pass reduction)
            in_specs=[pl.BlockSpec((block_b, D), lambda i: (i, 0))],
            out_specs=pl.BlockSpec((block_b, D), lambda i: (i, 0)),
        ),
        compiler_params=pltpu.CompilerParams(
            dimension_semantics=("parallel",),
            vmem_limit_bytes=vmem_limit,
        ),
    )(x_in)

    if B_pad != B:
        out = out[:B]
    return out


def normalize_module_forward(features: dict) -> dict:
    """Pallas equivalent of Normalize.forward: updates the features dict."""
    features.update(
        {"sentence_embedding": normalize_sentence_embedding(features["sentence_embedding"])}
    )
    return features


def _reference(x):
    return x / jnp.maximum(jnp.linalg.norm(x, axis=1, keepdims=True), _EPS)


if __name__ == "__main__":
    key = jax.random.PRNGKey(0)

    # Small shapes consistent with (batch, hidden) sentence embeddings.
    k1, k2 = jax.random.split(key)

    # Case 1: batch divisible by sublane packing.
    x1 = jax.random.normal(k1, (8, 128), dtype=jnp.float32)
    out1 = normalize_module_forward({"sentence_embedding": x1})["sentence_embedding"]
    out1 = jax.block_until_ready(out1)
    assert out1.shape == x1.shape
    assert jnp.allclose(out1, _reference(x1), atol=1e-5, rtol=1e-5)
    assert jnp.allclose(jnp.linalg.norm(out1, axis=1), 1.0, atol=1e-5)

    # Case 2: ragged batch (exercises the padding / remainder path).
    x2 = jax.random.normal(k2, (13, 256), dtype=jnp.float32)
    out2 = normalize_module_forward({"sentence_embedding": x2})["sentence_embedding"]
    out2 = jax.block_until_ready(out2)
    assert out2.shape == x2.shape
    assert jnp.allclose(out2, _reference(x2), atol=1e-5, rtol=1e-5)
    assert jnp.allclose(jnp.linalg.norm(out2, axis=1), 1.0, atol=1e-5)

    print("KERNEL_OK")
</pallas_src>

<mosaic_0001>
module attributes {stable_mosaic.version = 11 : i64} {
  func.func @_l2_normalize_kernel(%arg0: i32, %arg1: memref<8x128xf32, #tpu.memory_space<vmem>>, %arg2: memref<8x128xf32, #tpu.memory_space<vmem>>) attributes {dimension_semantics = [#tpu.dimension_semantics<parallel>], iteration_bounds = array<i64: 1>, scalar_prefetch = 0 : i64, scratch_operands = 0 : i64, tpu.core_type = #tpu.core_type<tc>, window_params = [{transform_indices = @transform_0, window_bounds = array<i64: 8, 128>}, {transform_indices = @transform_1, window_bounds = array<i64: 8, 128>}]} {
    %c0 = arith.constant 0 : index
    %c0_0 = arith.constant 0 : index
    %0 = vector.load %arg1[%c0, %c0_0] : memref<8x128xf32, #tpu.memory_space<vmem>>, vector<8x128xf32>
    %1 = arith.mulf %0, %0 : vector<8x128xf32>
    %cst = arith.constant dense<0.000000e+00> : vector<8xf32>
    %2 = vector.multi_reduction <add>, %1, %cst [1] : vector<8x128xf32> to vector<8xf32>
    %3 = vector.shape_cast %2 : vector<8xf32> to vector<8x1xf32>
    %cst_1 = arith.constant 1.000000e-24 : f32
    %4 = vector.broadcast %cst_1 : f32 to vector<8x1xf32>
    %5 = arith.maximumf %3, %4 : vector<8x1xf32>
    %6 = math.rsqrt %5 : vector<8x1xf32>
    %7 = vector.broadcast %6 : vector<8x1xf32> to vector<8x128xf32>
    %8 = arith.mulf %0, %7 : vector<8x128xf32>
    %c0_2 = arith.constant 0 : index
    %c0_3 = arith.constant 0 : index
    %9 = vector.load %arg2[%c0_2, %c0_3] : memref<8x128xf32, #tpu.memory_space<vmem>>, vector<8x128xf32>
    tpu.vector_store %arg2[%c0_2, %c0_3], %8 {strides = array<i32>} : memref<8x128xf32, #tpu.memory_space<vmem>>, vector<8x128xf32>,
    return
  }
  func.func @transform_0(%arg0: i32) -> (i32, i32) {
    %c0_i32 = arith.constant 0 : i32
    %c0_i32_0 = arith.constant 0 : i32
    return %arg0, %c0_i32 : i32, i32
  }
  func.func @transform_1(%arg0: i32) -> (i32, i32) {
    %c0_i32 = arith.constant 0 : i32
    %c0_i32_0 = arith.constant 0 : i32
    return %arg0, %c0_i32 : i32, i32
  }
}

</mosaic_0001>

<bundles_post_ra>
// kernel: normalize_sentence_embedding.1
= control target key start
LH: loop header
LB: loop body
LE: loop exit
PB: predicated region body
PF: predicated region fallthrough
CT: control target
= control target key end

     0   :  { %6 = vsyncpa [#allocation3], 0  ;;  %s132_s0 = inlined_call_operand.hbm [shape: f32[8,128], index: 0, kind: input, shape index: {}]   ;;  %s133_s1 = inlined_call_operand.hbm [shape: f32[8,128], index: 1, kind: output, shape index: {}]  }
   0x1   :  { %7 = vsyncpa [#allocation4], 0  ;;  %s96_s6 = smov [#allocation2]   ;;  %s48_s10 = scalar_lea.hbm %s132_s0, 128 }
   0x2   :  { %s14_s7 = sshll.u32 %s96_s6, 4  ;;  %p49_p0 = scmp.ne.s32.totalorder %s132_s0, %s48_s10  ;;  %s15_s7 = int_to_ptr.vmem [resolvable:$true] %s14_s7 }
   0x3   :  { %p52_p1 = scmp.lt.u32.totalorder %s48_s10, %s132_s0 }
   0x5   :  { %p54_p2 = pnand %p52_p1, %p49_p0 }
   0x7   :  { %57 = shalt.err (!%p54_p2)
}
   0x8   :  { %s58_s15 = scalar_lea.vmem %s15_s7, 128  ;;  %p63_p4 = scmp.lt.s32.totalorder %s15_s7, %s15_s7 }
   0x9   :  { %p59_p3 = scmp.ne.s32.totalorder %s15_s7, %s58_s15  ;;  %p64_p5 = scmp.lt.s32.totalorder %s58_s15, %s58_s15 }
   0xb   :  { %p65_p6 = por %p64_p5, %p63_p4 }
   0xd   :  { %p66_p7 = pnand %p65_p6, %p59_p3 }
   0xf   :  { %69 = shalt.err (!%p66_p7)
}
  0x10   :  { %17 = dma.hbm_to_vmem [thread:$0]  %s132_s0, 128, %s15_s7, [#allocation3]  }
  0x11   :  { %92 = dma.done.wait [#allocation3], 128  }
  0x12   :  { %93 = vsyncadd [#allocation3], 4294967168  ;;  %v21_v0 = vld [vmem:[#allocation2] sm:$0xff]  ;;  %s97_s18 = smov [#allocation5]  }
  0x13   :  { %v22_v1 = vmul.f32 %v21_v0, %v21_v0  ;;  %s35_s19 = sshll.u32 %s97_s18, 4  ;;  %s36_s19 = int_to_ptr.vmem [resolvable:$true] %s35_s19 }
  0x14   :  { %s70_s20 = scalar_lea.vmem %s36_s19, 128  ;;  %p75_p9 = scmp.lt.s32.totalorder %s36_s19, %s36_s19 }
  0x15   :  { %23 = vadd.xlane.f32.xlu0 %v22_v1  ;;  %p71_p8 = scmp.ne.s32.totalorder %s36_s19, %s70_s20  ;;  %p76_p10 = scmp.lt.s32.totalorder %s70_s20, %s70_s20 }
  0x17   :  { %p77_p11 = por %p76_p10, %p75_p9 }
  0x19   :  { %p78_p12 = pnand %p77_p11, %p71_p8 }
  0xa2   :  { %v24_v2 = vpop.xlane.xlu0 %23 }
  0xa3   :  { %v25_v3 = vmax.f32 %v24_v2, 1e-24 }
  0xa5   :  { %46 = vrsqrt.f32 %v25_v3 }
  0xaf   :  { %v47_v4 = vpop.eup %46 }
  0xb0   :  { %v27_v5 = vmul.f32 %v47_v4, %v21_v0 }
  0xb2   :  { %28 = vst [vmem:[#allocation5] sm:$0xff] %v27_v5 }
  0xb3   :  { %81 = shalt.err (!%p78_p12)
}
  0xb4   :  { %s82_s22 = scalar_lea.hbm %s133_s1, 128 }
  0xb5   :  { %p83_p13 = scmp.ne.s32.totalorder %s133_s1, %s82_s22  ;;  %p86_p0 = scmp.lt.u32.totalorder %s82_s22, %s133_s1 }
  0xb7   :  { %p88_p1 = pnand %p86_p0, %p83_p13 }
  0xb9   :  { %91 = shalt.err (!%p88_p1)
}
  0xba   :  { %38 = dma.vmem_to_hbm [thread:$0]  %s36_s19, 128, %s133_s1, [#allocation4]  }
  0xbb   :  { %94 = dma.done.wait [#allocation4], 128  }
  0xbc   :  { %95 = vsyncadd [#allocation4], 4294967168 }
  0xbd   :  { %42 = vsyncpa [#allocation3], 1 }
  0xbe   :  { %43 = vsyncpa [#allocation4], 1 }

</bundles_post_ra>
